<compile_context>
chip_gen: v6e
topology: v6e:2x2x1
jax: 0.10.0
libtpu: 0.0.40
codegen_flags: <defaults>
</compile_context>

<pallas_src>
import jax
import jax.numpy as jnp
from jax import lax
from jax.experimental import pallas as pl
from jax.experimental.pallas import tpu as pltpu

# ---------------------------------------------------------------------------
# Small test shapes (lane-aligned; production MoCo uses dim=128, K=65536).
C_IN = 128          # input feature dim of the synthetic base encoder
DIM = 128           # MoCo feature dim (lane-aligned; module default is 30)
K_QUEUE = 512       # queue size (module default 4000; small, multiple of TK)
BATCH = 8           # K_QUEUE % BATCH == 0 is asserted, as in the module
TK = 128            # queue rows per grid step (K tile)
M_MOMENTUM = 0.999  # unused: reference momentum update is a no-op (local rebind)
T_TEMP = 0.07
EPS = 1e-12         # torch F.normalize eps
LANE = 128          # TPU lane width


def moco_kernel(ptr_ref, im_q_ref, im_k_ref, w_ref, b_ref,
                queue_tile_ref, queue_hbm_ref,
                l_pos_ref, l_neg_ref, queue_out_ref,
                q_sc_ref, k_sc_ref, copy_sem):
    """Fused MoCo forward, grid = (K // TK,) over the queue axis.

    Inputs:
      ptr_ref        (1,)  int32 SMEM   queue_ptr
      im_q_ref       (N,C) f32  VMEM    query batch (resident)
      im_k_ref       (N,C) f32  VMEM    key batch (resident)
      w_ref          (C,D) f32  VMEM    shared encoder fc weight (resident)
      b_ref          (1,D) f32  VMEM    shared encoder fc bias (resident)
      queue_tile_ref (TK,D) bf16 VMEM   current queue tile (auto-pipelined)
      queue_hbm_ref  (K,D) bf16 ANY     alias source only (unused in body)
    Outputs:
      l_pos_ref      (N,128) f32 VMEM   l_pos / T, broadcast over lanes (resident)
      l_neg_ref      (N,TK)  f32 VMEM   l_neg / T tile (streamed, lane-dense)
      queue_out_ref  (K,D)  bf16 ANY    queue buffer (aliased); enqueue via DMA
    Scratch:
      q_sc_ref       (N,D) bf16         normalize(q) * (1/T)
      k_sc_ref       (N,D) bf16         normalize(k)  (enqueue DMA source)
      copy_sem                          DMA completion semaphore
    """
    del queue_hbm_ref  # alias source only; the enqueue writes queue_out_ref.

    kb = pl.program_id(0)
    n = im_q_ref.shape[0]
    inv_t = jnp.float32(1.0 / T_TEMP)
    eps2 = jnp.float32(EPS * EPS)

    @pl.when(kb == 0)
    def _encode():
        # encoder fc; encoder_k == encoder_q (reference momentum update is a no-op).
        # TODO(synk): if the momentum update is ever made real, split weights.
        q = jnp.dot(im_q_ref[...], w_ref[...],
                    preferred_element_type=jnp.float32) + b_ref[...]
        k = jnp.dot(im_k_ref[...], w_ref[...],
                    preferred_element_type=jnp.float32) + b_ref[...]
        # row L2 normalize == torch F.normalize(x, dim=1); rsqrt -> EUP.
        q = q * lax.rsqrt(jnp.maximum(jnp.sum(q * q, axis=1, keepdims=True), eps2))
        k = k * lax.rsqrt(jnp.maximum(jnp.sum(k * k, axis=1, keepdims=True), eps2))
        # Fold 1/T into q once: l_pos = sum(q_sc*k) and l_neg = q_sc @ queue^T
        # both inherit the 1/T factor, so no per-logit multiply later.
        q = q * inv_t
        l_pos_ref[...] = jnp.broadcast_to(
            jnp.sum(q * k, axis=1, keepdims=True), l_pos_ref.shape)
        q_sc_ref[...] = q.astype(q_sc_ref.dtype)
        k_sc_ref[...] = k.astype(k_sc_ref.dtype)

    # l_neg tile: (N,D) x (TK,D) contracting D (MXU-native, no transpose), f32 acc.
    l_neg_ref[...] = lax.dot_general(
        q_sc_ref[...], queue_tile_ref[...],
        dimension_numbers=(((1,), (1,)), ((), ())),
        preferred_element_type=jnp.float32)

    @pl.when(kb == pl.num_programs(0) - 1)
    def _enqueue():
        # queue[ptr:ptr+N, :] = k  -- in-place HBM write of ONLY the N new rows.
        # Ordering is safe: all queue-tile read DMAs (for l_neg) have completed
        # before this last-iteration body runs (the pipeline waits on the current
        # tile's DMA before invoking the body), so the write cannot race a read.
        ptr = pl.multiple_of(ptr_ref[0], n)   # K % N == 0 (asserted in wrapper)
        cp = pltpu.make_async_copy(k_sc_ref,
                                   queue_out_ref.at[pl.ds(ptr, n)],
                                   copy_sem)
        cp.start()
        cp.wait()


def moco_forward(im_q, im_k, w, b, queue, queue_ptr, *, tk=TK):
    """Single pallas_call: encode, logits, and in-place (aliased) queue update.

    `queue` is stored (K, dim) row-major in bfloat16 (the transpose of torch's
    f32 (dim, K) buffer): each row is one unit-norm negative key, the enqueue is
    a contiguous N-row write, and l_neg needs no transpose.
    Returns (logits, labels, new_queue, new_queue_ptr).
    NOTE: for the in-place enqueue to avoid a defensive copy, donate `queue`
    at the jit boundary (donate_argnums=(4,)).
    """
    n, c = im_q.shape
    dim = w.shape[1]
    kq = queue.shape[0]
    assert kq % n == 0        # mirrors `assert self.K % batch_size == 0`
    assert kq % tk == 0
    num_k_blocks = kq // tk
    qbytes = jnp.dtype(queue.dtype).itemsize

    cost = pl.CostEstimate(
        flops=2 * (2 * n * c * dim) + 2 * n * dim * kq,
        transcendentals=2 * n,
        bytes_accessed=(kq * dim * qbytes          # queue stream (read)
                        + n * dim * qbytes         # enqueue write
                        + 2 * n * c * 4            # im_q, im_k
                        + c * dim * 4 + dim * 4    # w, b
                        + n * kq * 4 + n * LANE * 4))  # l_neg, l_pos

    l_pos, l_neg, new_queue = pl.pallas_call(
        moco_kernel,
        out_shape=(
            jax.ShapeDtypeStruct((n, LANE), jnp.float32),    # l_pos (lane-broadcast)
            jax.ShapeDtypeStruct((n, kq), jnp.float32),      # l_neg
            jax.ShapeDtypeStruct((kq, dim), queue.dtype),    # updated queue (aliased)
        ),
        grid=(num_k_blocks,),
        in_specs=[
            pl.BlockSpec(memory_space=pltpu.MemorySpace.SMEM),   # queue_ptr
            pl.BlockSpec(memory_space=pltpu.MemorySpace.VMEM),   # im_q   (resident)
            pl.BlockSpec(memory_space=pltpu.MemorySpace.VMEM),   # im_k   (resident)
            pl.BlockSpec(memory_space=pltpu.MemorySpace.VMEM),   # w      (resident)
            pl.BlockSpec(memory_space=pltpu.MemorySpace.VMEM),   # b      (resident)
            pl.BlockSpec((tk, dim), lambda kb: (kb, 0)),         # queue tiles (streamed)
            pl.BlockSpec(memory_space=pl.ANY),                   # queue HBM (alias src)
        ],
        out_specs=(
            pl.BlockSpec((n, LANE), lambda kb: (0, 0)),          # l_pos (resident)
            pl.BlockSpec((n, tk), lambda kb: (0, kb)),           # l_neg tiles (streamed)
            pl.BlockSpec(memory_space=pl.ANY),                   # queue (in-place enqueue)
        ),
        scratch_shapes=[
            pltpu.VMEM((n, dim), queue.dtype),   # q * (1/T)  (bf16)
            pltpu.VMEM((n, dim), queue.dtype),   # k          (bf16, DMA source)
            pltpu.SemaphoreType.DMA(()),         # enqueue DMA completion
        ],
        input_output_aliases={6: 2},             # queue (ANY input) -> new_queue
        compiler_params=pltpu.CompilerParams(
            # The K axis carries the kb==0 encoder scratch and the last-iteration
            # enqueue ordering, so it must stay sequential.
            # TODO(synk): for v7x dual-TC, split l_neg into its own pallas_call
            # with a "parallel" K axis and do the enqueue in a separate tiny call.
            dimension_semantics=("arbitrary",),
            has_side_effects=True,
        ),
        cost_estimate=cost,
    )(queue_ptr, im_q, im_k, w, b, queue, queue)

    # torch.cat([l_pos, l_neg], dim=1) / T  (1/T already folded into q in-kernel).
    logits = jnp.concatenate([l_pos[:, :1], l_neg], axis=1)
    # TODO(synk): torch uses int64 labels; int32 used here (JAX x64 disabled).
    labels = jnp.zeros((n,), dtype=jnp.int32)
    new_ptr = (queue_ptr + n) % kq               # queue_ptr[0] = (ptr + N) % K
    return logits, labels, new_queue, new_ptr


def init_params(key):
    """Deterministic synthetic parameters (matches __init__ shapes/invariants)."""
    k_w, k_b, k_queue = jax.random.split(key, 3)
    # base encoder instantiated as its final fc: Linear(C_IN -> DIM), stored
    # (C_IN, DIM) == torch weight.T; encoder_k is a bitwise copy of encoder_q.
    w = jax.random.normal(k_w, (C_IN, DIM), jnp.float32) * (1.0 / (C_IN ** 0.5))
    b = jax.random.normal(k_b, (1, DIM), jnp.float32) * 0.01
    # queue = normalize(randn(dim, K), dim=0), stored transposed as (K, dim):
    # each row is one unit-norm negative key.  Stored bf16 (perf: halves the
    # HBM/VMEM traffic of the l_neg stream and the enqueue write).
    q0 = jax.random.normal(k_queue, (K_QUEUE, DIM), jnp.float32)
    q0 = q0 * lax.rsqrt(jnp.maximum(jnp.sum(q0 * q0, axis=1, keepdims=True),
                                    jnp.float32(EPS * EPS)))
    queue = q0.astype(jnp.bfloat16)
    queue_ptr = jnp.zeros((1,), dtype=jnp.int32)
    return w, b, queue, queue_ptr


def moco_reference(im_q, im_k, w, b, queue_f32, queue_ptr):
    """Pure-JAX reference of the PyTorch forward (queue stored (K, dim), f32)."""
    def normalize(x):
        nrm = jnp.sqrt(jnp.sum(x * x, axis=1, keepdims=True))
        return x / jnp.maximum(nrm, EPS)
    q = normalize(im_q @ w + b)
    k = normalize(im_k @ w + b)
    l_pos = jnp.sum(q * k, axis=1, keepdims=True)
    l_neg = q @ queue_f32.T
    logits = jnp.concatenate([l_pos, l_neg], axis=1) / T_TEMP
    labels = jnp.zeros((im_q.shape[0],), jnp.int32)
    new_queue = lax.dynamic_update_slice(queue_f32, k, (queue_ptr[0], 0))
    new_ptr = (queue_ptr + im_q.shape[0]) % queue_f32.shape[0]
    return logits, labels, new_queue, new_ptr


if __name__ == "__main__":
    key = jax.random.PRNGKey(0)
    k_q, k_k, k_params = jax.random.split(key, 3)

    im_q = jax.random.normal(k_q, (BATCH, C_IN), jnp.float32)
    im_k = jax.random.normal(k_k, (BATCH, C_IN), jnp.float32)
    w, b, queue_bf16, queue_ptr = init_params(k_params)
    queue_f32 = queue_bf16.astype(jnp.float32)   # separate buffer for the reference

    # Run the reference FIRST: queue_bf16's buffer is donated to the kernel below.
    r_logits, r_labels, r_queue, r_ptr = moco_reference(
        im_q, im_k, w, b, queue_f32, queue_ptr)
    jax.block_until_ready((r_logits, r_queue))

    # Donate the queue so input_output_aliases is a real in-place alias.
    fwd = jax.jit(moco_forward, donate_argnums=(4,))
    logits, labels, new_queue, new_ptr = fwd(im_q, im_k, w, b, queue_bf16, queue_ptr)
    jax.block_until_ready((logits, labels, new_queue, new_ptr))

    # structural checks
    assert logits.shape == (BATCH, K_QUEUE + 1)
    assert labels.shape == (BATCH,)
    assert new_queue.shape == (K_QUEUE, DIM)
    assert new_queue.dtype == jnp.bfloat16
    assert new_ptr.shape == (1,)
    assert bool(jnp.all(jnp.isfinite(logits)))

    # numerical checks (loose tol: bf16 queue / bf16 q in the l_neg MXU path)
    assert bool(jnp.allclose(logits, r_logits, rtol=3e-2, atol=3e-2))
    assert bool(jnp.allclose(new_queue.astype(jnp.float32), r_queue,
                             rtol=3e-2, atol=3e-2))
    assert bool(jnp.all(labels == r_labels))
    assert bool(jnp.all(new_ptr == r_ptr))

    print("KERNEL_OK")
</pallas_src>

<mosaic_0001>
module attributes {stable_mosaic.version = 11 : i64} {
  func.func @moco_kernel(%arg0: i32, %arg1: memref<1xi32, #tpu.memory_space<smem>>, %arg2: memref<8x128xf32, #tpu.memory_space<vmem>>, %arg3: memref<8x128xf32, #tpu.memory_space<vmem>>, %arg4: memref<128x128xf32, #tpu.memory_space<vmem>>, %arg5: memref<1x128xf32, #tpu.memory_space<vmem>>, %arg6: memref<128x128xbf16, #tpu.memory_space<vmem>>, %arg7: memref<512x128xbf16, #tpu.memory_space<any>>, %arg8: memref<8x128xf32, #tpu.memory_space<vmem>>, %arg9: memref<8x128xf32, #tpu.memory_space<vmem>>, %arg10: memref<512x128xbf16, #tpu.memory_space<any>>, %arg11: memref<8x128xbf16, #tpu.memory_space<vmem>>, %arg12: memref<8x128xbf16, #tpu.memory_space<vmem>>, %arg13: memref<!tpu.dma_semaphore, #tpu.memory_space<semaphore_mem>>) attributes {dimension_semantics = [#tpu.dimension_semantics<arbitrary>], iteration_bounds = array<i64: 4>, scalar_prefetch = 0 : i64, scratch_operands = 3 : i64, tpu.core_type = #tpu.core_type<tc>, window_params = [{transform_indices = @transform_0, window_bounds = array<i64: 1>}, {pipeline_mode = #tpu.pipeline_mode<synchronous>, transform_indices = @transform_1, window_bounds = array<i64: 8, 128>}, {pipeline_mode = #tpu.pipeline_mode<synchronous>, transform_indices = @transform_2, window_bounds = array<i64: 8, 128>}, {pipeline_mode = #tpu.pipeline_mode<synchronous>, transform_indices = @transform_3, window_bounds = array<i64: 128, 128>}, {pipeline_mode = #tpu.pipeline_mode<synchronous>, transform_indices = @transform_4, window_bounds = array<i64: 1, 128>}, {transform_indices = @transform_5, window_bounds = array<i64: 128, 128>}, {}, {pipeline_mode = #tpu.pipeline_mode<synchronous>, transform_indices = @transform_7, window_bounds = array<i64: 8, 128>}, {transform_indices = @transform_8, window_bounds = array<i64: 8, 128>}, {}]} {
    %c0_i32 = arith.constant 0 : i32
    %0 = arith.cmpi eq, %arg0, %c0_i32 : i32
    %1 = arith.extui %0 : i1 to i32
    %cst = arith.constant 1.000000e-24 : f32
    %cst_0 = arith.constant 14.2857141 : f32
    %c0_i32_1 = arith.constant 0 : i32
    %2 = arith.cmpi ne, %1, %c0_i32_1 : i32
    scf.if %2 {
      %c0_9 = arith.constant 0 : index
      %c0_10 = arith.constant 0 : index
      %10 = vector.load %arg2[%c0_9, %c0_10] : memref<8x128xf32, #tpu.memory_space<vmem>>, vector<8x128xf32>
      %c0_11 = arith.constant 0 : index
      %c0_12 = arith.constant 0 : index
      %11 = vector.load %arg4[%c0_11, %c0_12] : memref<128x128xf32, #tpu.memory_space<vmem>>, vector<128x128xf32>
      %cst_13 = arith.constant dense<0.000000e+00> : vector<8x128xf32>
      %12 = tpu.matmul %10, %11, %cst_13 {dimension_numbers = #tpu.dot_dimension_numbers<[1], [0], [0], [1], [0, 0, 1, 1], [], []>} : vector<8x128xf32>, vector<128x128xf32>, vector<8x128xf32> -> vector<8x128xf32>
      %c0_14 = arith.constant 0 : index
      %c0_15 = arith.constant 0 : index
      %13 = vector.load %arg5[%c0_14, %c0_15] : memref<1x128xf32, #tpu.memory_space<vmem>>, vector<1x128xf32>
      %14 = vector.broadcast %13 : vector<1x128xf32> to vector<8x128xf32>
      %15 = arith.addf %12, %14 : vector<8x128xf32>
      %c0_16 = arith.constant 0 : index
      %c0_17 = arith.constant 0 : index
      %16 = vector.load %arg3[%c0_16, %c0_17] : memref<8x128xf32, #tpu.memory_space<vmem>>, vector<8x128xf32>
      %c0_18 = arith.constant 0 : index
      %c0_19 = arith.constant 0 : index
      %17 = vector.load %arg4[%c0_18, %c0_19] : memref<128x128xf32, #tpu.memory_space<vmem>>, vector<128x128xf32>
      %cst_20 = arith.constant dense<0.000000e+00> : vector<8x128xf32>
      %18 = tpu.matmul %16, %17, %cst_20 {dimension_numbers = #tpu.dot_dimension_numbers<[1], [0], [0], [1], [0, 0, 1, 1], [], []>} : vector<8x128xf32>, vector<128x128xf32>, vector<8x128xf32> -> vector<8x128xf32>
      %c0_21 = arith.constant 0 : index
      %c0_22 = arith.constant 0 : index
      %19 = vector.load %arg5[%c0_21, %c0_22] : memref<1x128xf32, #tpu.memory_space<vmem>>, vector<1x128xf32>
      %20 = vector.broadcast %19 : vector<1x128xf32> to vector<8x128xf32>
      %21 = arith.addf %18, %20 : vector<8x128xf32>
      %22 = arith.mulf %15, %15 : vector<8x128xf32>
      %cst_23 = arith.constant dense<0.000000e+00> : vector<8xf32>
      %23 = vector.multi_reduction <add>, %22, %cst_23 [1] : vector<8x128xf32> to vector<8xf32>
      %24 = vector.shape_cast %23 : vector<8xf32> to vector<8x1xf32>
      %25 = vector.broadcast %cst : f32 to vector<8x1xf32>
      %26 = arith.maximumf %24, %25 : vector<8x1xf32>
      %27 = math.rsqrt %26 : vector<8x1xf32>
      %28 = vector.broadcast %27 : vector<8x1xf32> to vector<8x128xf32>
      %29 = arith.mulf %15, %28 : vector<8x128xf32>
      %30 = arith.mulf %21, %21 : vector<8x128xf32>
      %cst_24 = arith.constant dense<0.000000e+00> : vector<8xf32>
      %31 = vector.multi_reduction <add>, %30, %cst_24 [1] : vector<8x128xf32> to vector<8xf32>
      %32 = vector.shape_cast %31 : vector<8xf32> to vector<8x1xf32>
      %33 = vector.broadcast %cst : f32 to vector<8x1xf32>
      %34 = arith.maximumf %32, %33 : vector<8x1xf32>
      %35 = math.rsqrt %34 : vector<8x1xf32>
      %36 = vector.broadcast %35 : vector<8x1xf32> to vector<8x128xf32>
      %37 = arith.mulf %21, %36 : vector<8x128xf32>
      %38 = vector.broadcast %cst_0 : f32 to vector<8x128xf32>
      %39 = arith.mulf %29, %38 : vector<8x128xf32>
      %40 = arith.mulf %39, %37 : vector<8x128xf32>
      %cst_25 = arith.constant dense<0.000000e+00> : vector<8xf32>
      %41 = vector.multi_reduction <add>, %40, %cst_25 [1] : vector<8x128xf32> to vector<8xf32>
      %42 = vector.shape_cast %41 : vector<8xf32> to vector<8x1xf32>
      %43 = vector.shape_cast %42 : vector<8x1xf32> to vector<8x1xf32>
      %44 = vector.broadcast %43 : vector<8x1xf32> to vector<8x128xf32>
      %c0_26 = arith.constant 0 : index
      %c0_27 = arith.constant 0 : index
      %45 = vector.load %arg8[%c0_26, %c0_27] : memref<8x128xf32, #tpu.memory_space<vmem>>, vector<8x128xf32>
      tpu.vector_store %arg8[%c0_26, %c0_27], %44 {strides = array<i32>} : memref<8x128xf32, #tpu.memory_space<vmem>>, vector<8x128xf32>,
      %46 = arith.truncf %39 : vector<8x128xf32> to vector<8x128xbf16>
      %c0_28 = arith.constant 0 : index
      %c0_29 = arith.constant 0 : index
      %47 = vector.load %arg11[%c0_28, %c0_29] : memref<8x128xbf16, #tpu.memory_space<vmem>>, vector<8x128xbf16>
      tpu.vector_store %arg11[%c0_28, %c0_29], %46 {strides = array<i32>} : memref<8x128xbf16, #tpu.memory_space<vmem>>, vector<8x128xbf16>,
      %48 = arith.truncf %37 : vector<8x128xf32> to vector<8x128xbf16>
      %c0_30 = arith.constant 0 : index
      %c0_31 = arith.constant 0 : index
      %49 = vector.load %arg12[%c0_30, %c0_31] : memref<8x128xbf16, #tpu.memory_space<vmem>>, vector<8x128xbf16>
      tpu.vector_store %arg12[%c0_30, %c0_31], %48 {strides = array<i32>} : memref<8x128xbf16, #tpu.memory_space<vmem>>, vector<8x128xbf16>,
    } else {
    }
    %c0 = arith.constant 0 : index
    %c0_2 = arith.constant 0 : index
    %3 = vector.load %arg11[%c0, %c0_2] : memref<8x128xbf16, #tpu.memory_space<vmem>>, vector<8x128xbf16>
    %c0_3 = arith.constant 0 : index
    %c0_4 = arith.constant 0 : index
    %4 = vector.load %arg6[%c0_3, %c0_4] : memref<128x128xbf16, #tpu.memory_space<vmem>>, vector<128x128xbf16>
    %cst_5 = arith.constant dense<0.000000e+00> : vector<8x128xf32>
    %5 = tpu.matmul %3, %4, %cst_5 {dimension_numbers = #tpu.dot_dimension_numbers<[1], [1], [0], [0], [0, 0, 1, 0], [], []>} : vector<8x128xbf16>, vector<128x128xbf16>, vector<8x128xf32> -> vector<8x128xf32>
    %c0_6 = arith.constant 0 : index
    %c0_7 = arith.constant 0 : index
    %6 = vector.load %arg9[%c0_6, %c0_7] : memref<8x128xf32, #tpu.memory_space<vmem>>, vector<8x128xf32>
    tpu.vector_store %arg9[%c0_6, %c0_7], %5 {strides = array<i32>} : memref<8x128xf32, #tpu.memory_space<vmem>>, vector<8x128xf32>,
    %c3_i32 = arith.constant 3 : i32
    %7 = arith.cmpi eq, %arg0, %c3_i32 : i32
    %8 = arith.extui %7 : i1 to i32
    %c0_i32_8 = arith.constant 0 : i32
    %9 = arith.cmpi ne, %8, %c0_i32_8 : i32
    scf.if %9 {
      %c0_9 = arith.constant 0 : index
      %10 = memref.load %arg1[%c0_9] : memref<1xi32, #tpu.memory_space<smem>>
      %11 = tpu.assume_multiple %10, 8 : i32
      %c0_i32_10 = arith.constant 0 : i32
      %12 = tpu.memref_slice %arg10[%11, %c0_i32_10] : memref<512x128xbf16, #tpu.memory_space<any>> -> memref<8x128xbf16, #tpu.memory_space<any>>
      tpu.enqueue_dma source(%arg12 : memref<8x128xbf16, #tpu.memory_space<vmem>>) target(%12 : memref<8x128xbf16, #tpu.memory_space<any>>) target_semaphore(%arg13 : memref<!tpu.dma_semaphore, #tpu.memory_space<semaphore_mem>>)
      %c0_i32_11 = arith.constant 0 : i32
      %13 = tpu.memref_slice %arg10[%11, %c0_i32_11] : memref<512x128xbf16, #tpu.memory_space<any>> -> memref<8x128xbf16, #tpu.memory_space<any>>
      tpu.wait_dma2 semaphore(%arg13 : memref<!tpu.dma_semaphore, #tpu.memory_space<semaphore_mem>>) src(%arg12 : memref<8x128xbf16, #tpu.memory_space<vmem>>) dst(%13 : memref<8x128xbf16, #tpu.memory_space<any>>)
    } else {
    }
    return
  }
  func.func @transform_0(%arg0: i32) -> i32 {
    %c0_i32 = arith.constant 0 : i32
    %c0_i32_0 = arith.constant 0 : i32
    return %c0_i32 : i32
  }
  func.func @transform_1(%arg0: i32) -> (i32, i32) {
    %c0_i32 = arith.constant 0 : i32
    %c0_i32_0 = arith.constant 0 : i32
    %c0_i32_1 = arith.constant 0 : i32
    return %c0_i32, %c0_i32_0 : i32, i32
  }
  func.func @transform_2(%arg0: i32) -> (i32, i32) {
    %c0_i32 = arith.constant 0 : i32
    %c0_i32_0 = arith.constant 0 : i32
    %c0_i32_1 = arith.constant 0 : i32
    return %c0_i32, %c0_i32_0 : i32, i32
  }
  func.func @transform_3(%arg0: i32) -> (i32, i32) {
    %c0_i32 = arith.constant 0 : i32
    %c0_i32_0 = arith.constant 0 : i32
    %c0_i32_1 = arith.constant 0 : i32
    return %c0_i32, %c0_i32_0 : i32, i32
  }
  func.func @transform_4(%arg0: i32) -> (i32, i32) {
    %c0_i32 = arith.constant 0 : i32
    %c0_i32_0 = arith.constant 0 : i32
    %c0_i32_1 = arith.constant 0 : i32
    return %c0_i32, %c0_i32_0 : i32, i32
  }
  func.func @transform_5(%arg0: i32) -> (i32, i32) {
    %c0_i32 = arith.constant 0 : i32
    %c0_i32_0 = arith.constant 0 : i32
    return %arg0, %c0_i32 : i32, i32
  }
  func.func @transform_7(%arg0: i32) -> (i32, i32) {
    %c0_i32 = arith.constant 0 : i32
    %c0_i32_0 = arith.constant 0 : i32
    %c0_i32_1 = arith.constant 0 : i32
    return %c0_i32, %c0_i32_0 : i32, i32
  }
  func.func @transform_8(%arg0: i32) -> (i32, i32) {
    %c0_i32 = arith.constant 0 : i32
    %c0_i32_0 = arith.constant 0 : i32
    return %c0_i32, %arg0 : i32, i32
  }
}

</mosaic_0001>

<bundles_post_ra>
// kernel: moco_forward.1
= control target key start
LH: loop header
LB: loop body
LE: loop exit
PB: predicated region body
PF: predicated region fallthrough
CT: control target
= control target key end

     0   :  { %s1377_s0 = inlined_call_operand.<no memory space> [shape: s32[1], index: 0, kind: input, shape index: {}]   ;;  %s1378_s1 = inlined_call_operand.hbm [shape: f32[8,128], index: 1, kind: input, shape index: {}]   ;;  %s1379_s2 = inlined_call_operand.hbm [shape: f32[8,128], index: 2, kind: input, shape index: {}]   ;;  %s1380_s3 = inlined_call_operand.hbm [shape: f32[128,128], index: 3, kind: input, shape index: {}]   ;;  %s1381_s4 = inlined_call_operand.hbm [shape: f32[1,128], index: 4, kind: input, shape index: {}]   ;;  %s1382_s5 = inlined_call_operand.vmem [shape: bf16[512,128], index: 5, kind: input, shape index: {}]   ;;  %s1383_s6 = inlined_call_operand.vmem [shape: bf16[512,128], index: 6, kind: input, shape index: {}, may-alias: {6,9}]   ;;  %s1384_s7 = inlined_call_operand.vmem [shape: f32[8,128], index: 7, kind: output, shape index: {0}]   ;;  %s1385_s8 = inlined_call_operand.vmem [shape: f32[8,512], index: 8, kind: output, shape index: {1}]   ;;  %s1386_s9 = inlined_call_operand.vmem [shape: bf16[512,128], index: 9, kind: output, shape index: {2}, may-alias: {6,9}]  }
   0x1   :  { %15 = sst [smem:[#allocation5]] %s1377_s0 }
   0x2   :  { %16 = vsyncpa [#allocation7], 0 }
   0x3   :  { %17 = vsyncpa [#allocation9], 0 }
   0x4   :  { %18 = vsyncpa [#allocation12], 0  ;;  %s1227_s11 = smov 0  }
   0x5 LB: > { %s1164_s6 = smov [#allocation8]   ;;  %s1233_s13 = sadd.s32 4294967295, %s1162_s11   ;;  %s1162_s11 = sphi %s1227_s11, %s24_s11  }
   0x6   : > { %s234_s12 = sshll.u32 %s1164_s6, 4  ;;  %p809_p0 = scmp.ge.s32.totalorder %s1162_s11, 1  ;;  %s235_s12 = int_to_ptr.vmem [resolvable:$true] %s234_s12 }
   0x7   : > { %p207_p1 = scmp.lt.s32.totalorder %s1162_s11, 5  ;;  %p1387_p3 = scmp.eq.s32.totalorder %s1233_s13, 0 }
   0x8   : > { %s1165_s14 = smov [#allocation6]   ;;  %s1166_s16 = smov [#allocation10]  }
   0x9   : > { %p1239_p4 = pnand %p809_p0, %p207_p1  ;;  %s223_s15 = sshll.u32 %s1165_s14, 4  ;;  %s224_s15 = int_to_ptr.vmem [resolvable:$true] %s223_s15 }
   0xa   : > { %s244_s17 = sshll.u32 %s1166_s16, 4  ;;  %s1167_s19 = smov [#allocation11]   ;;  %s1251_s17 = int_to_ptr.vmem [resolvable:$true] %s244_s17 }
   0xb   : > { %s1389_s0 = scalar_select %p1239_p4, 1, 0 }
   0xc   : > { %p987_p5 = pneg %p1239_p4  ;;  %s1253_s20 = sshll.u32 %s1167_s19, 4  ;;  %s259_s20 = int_to_ptr.vmem [resolvable:$true] %s1253_s20 }
   0xd   : > { %s1049_s21 = scalar_lea.vmem %s235_s12, 128  ;;  %p1057_p11 = scmp.lt.s32.totalorder %s235_s12, %s235_s12 }
   0xe   : > { %p1247_p6 = pnand %p1387_p3, %p987_p5  ;;  %p1050_p8 = scmp.ne.s32.totalorder %s235_s12, %s1049_s21 }
   0xf   : > { %p1058_p12 = scmp.lt.s32.totalorder %s1049_s21, %s1049_s21 }
  0x10   : > { %p1040_p7 = pneg %p1247_p6 }
  0x11   : > { %p1059_p13 = por %p1058_p12, %p1057_p11 }
  0x12   : > { %p1052_p9 = pnand %p1050_p8, %p1040_p7 }
  0x14   : > { %p1053_p10 = pneg %p1052_p9 }
  0x16   : > { %p1060_p0 = pnand %p1059_p13, %p1053_p10 }
  0x18   : > { %1063 = shalt.err (!%p1060_p0)
}
  0x19   : > { %993 = dma.hbm_to_vmem [thread:$0]  (!%p1247_p6), %s1379_s2, 128, %s235_s12, [#allocation9]  }
  0x1a   : > { %s1075_s24 = scalar_lea.vmem %s224_s15, 128  ;;  %p1083_p8 = scmp.lt.s32.totalorder %s224_s15, %s224_s15 }
  0x1b   : > { %p1076_p1 = scmp.ne.s32.totalorder %s224_s15, %s1075_s24  ;;  %p1084_p9 = scmp.lt.s32.totalorder %s1075_s24, %s1075_s24 }
  0x1d   : > { %p1078_p5 = pnand %p1076_p1, %p1040_p7  ;;  %p1085_p3 = por %p1084_p9, %p1083_p8 }
  0x1f   : > { %p1079_p2 = pneg %p1078_p5 }
  0x21   : > { %p1086_p4 = pnand %p1085_p3, %p1079_p2 }
  0x23   : > { %1089 = shalt.err (!%p1086_p4)
}
  0x24   : > { %990 = dma.hbm_to_vmem [thread:$0]  (!%p1247_p6), %s1378_s1, 128, %s224_s15, [#allocation7]  }
  0x25   : > { %s1101_s27 = scalar_lea.vmem %s1251_s17, 2048  ;;  %p1109_p13 = scmp.lt.s32.totalorder %s1251_s17, %s1251_s17 }
  0x26   : > { %p1102_p10 = scmp.ne.s32.totalorder %s1251_s17, %s1101_s27  ;;  %p1110_p2 = scmp.lt.s32.totalorder %s1101_s27, %s1101_s27 }
  0x28   : > { %p1104_p11 = pnand %p1102_p10, %p1040_p7  ;;  %p1111_p3 = por %p1110_p2, %p1109_p13 }
  0x2a   : > { %p1105_p12 = pneg %p1104_p11 }
  0x2c   : > { %p1112_p4 = pnand %p1111_p3, %p1105_p12 }
  0x2e   : > { %1115 = shalt.err (!%p1112_p4)
}
  0x2f   : > { %s1168_s28 = smov 128   ;;  %s1169_s29 = smov 8  }
  0x30   : > { %996 = dma.hbm_to_vmem [thread:$0]  (!%p1247_p6), %s1380_s3, 2048, %s1251_s17, [#allocation9], %s1168_s28, %s1168_s28, %s1169_s29  }
  0x31   : > { %s1127_s6 = scalar_lea.vmem %s259_s20, 16  ;;  %s1134_s12 = scalar_lea.vmem %s259_s20, 32 }
  0x32   : > { %p1128_p0 = scmp.ne.s32.totalorder %s259_s20, %s1127_s6  ;;  %p1135_p8 = scmp.lt.s32.totalorder %s259_s20, %s259_s20 }
  0x33   : > { %p1136_p9 = scmp.lt.s32.totalorder %s1134_s12, %s1127_s6 }
  0x34   : > { %p1130_p1 = pnand %p1128_p0, %p1040_p7 }
  0x35   : > { %p1137_p10 = por %p1136_p9, %p1135_p8 }
  0x36   : > { %p1131_p5 = pneg %p1130_p1 }
  0x38   : > { %p1138_p11 = pnand %p1137_p10, %p1131_p5 }
  0x3a   : > { %1141 = shalt.err (!%p1138_p11)
}
  0x3b   : > { %999 = dma.hbm_to_vmem [thread:$0]  (!%p1247_p6), %s1381_s4, 16, %s259_s20, [#allocation12]  }
  0x3c   : > { %p1391_p12 = scmp.ne.s32.totalorder %s1389_s0, 0 }
  0x3d   : > { %p1392_p13 = scmp.eq.s32.totalorder (!%p1391_p12), %s1233_s13, 0 }
  0x3e   : > { %280 = sbr.rel (%p1391_p12) target bundleno = 883 (0x373), region = 44 }
  0x43   : > { %1147 = dma.done.wait (%p1392_p13), [#allocation7], 128   ;;  %p1393_p7 = pmov %p1392_p13 }
  0x45   : > { %1149 = vsyncadd (%p1393_p7), [#allocation7], 4294967168  ;;  %p1394_p2 = pmov %p1393_p7 }
  0x47   : > { %1151 = dma.done.wait (%p1394_p2), [#allocation9], 2176   ;;  %p1395_p3 = pmov %p1394_p2 }
  0x48   : > { %p1396_p4 = pmov %p1394_p2 }
  0x49   : > { %1153 = vsyncadd (%p1395_p3), [#allocation9], 4294965120 }
  0x4a   : > { %1155 = dma.done.wait (%p1396_p4), [#allocation12], 16   ;;  %p1397_p6 = pmov %p1394_p2 }
  0x4b   : > { %s820_s0 = sshll.u32 %s1233_s13, 4  ;;  %p329_p0 = scmp.lt.s32.totalorder %s1233_s13, 3 }
  0x4c   : > { %1157 = vsyncadd (%p1397_p6), [#allocation12], 4294967280  ;;  %p324_p1 = scmp.lt.s32.totalorder %s820_s0, 63  ;;  %p1398_p5 = scmp.ne.s32.totalorder %s1233_s13, 0 }
  0x4d   : > { %s330_s16 = scalar_select %p329_p0, %s1233_s13, 3 }
  0x4e   : > { %s1400_s0 = smov (!%p324_p1, %s820_s0), 63  ;;  %337 = sbr.rel (%p1398_p5) target bundleno = 614 (0x266), region = 64 }
  0x4f   : > { %s822_s17 = sshll.u32 %s330_s16, 3  ;;  %s821_s18 = sshll.u32 %s1400_s0, 2 }
  0x50   : > { %s1315_s21 = scalar_lea.vmem %s1385_s8, %s822_s17  ;;  %s1320_s24 = scalar_lea.vmem %s1382_s5, %s821_s18 }
  0x53   : > { %v354_v0 = vld [vmem:[#allocation10 + $0x78] sm:$0xff]  ;;  %v1170_v1 = vmov 0.0   ;;  %v353_v2 = vld [vmem:[#allocation10 + $0x70] sm:$0xff]  ;;  %v352_v3 = vld [vmem:[#allocation10 + $0x68] sm:$0xff]  ;;  %vm1171_vm0 = vmmov 0  }
  0x54   : > { %881 = vmatprep.subr.mxu0 %v1170_v1  ;;  %916 = vmatprep.subr.mxu1 %v1170_v1  ;;  %v351_v4 = vld [vmem:[#allocation10 + $0x60] sm:$0xff]  ;;  %v350_v5 = vld [vmem:[#allocation10 + $0x58] sm:$0xff]  ;;  %v349_v6 = vld [vmem:[#allocation10 + $0x50] sm:$0xff] }
  0x55   : > { %882 = vmatpush3.msra.mxu0 %v354_v0  ;;  %917 = vmatpush3.msra.mxu1 %v354_v0  ;;  %v348_v7 = vld [vmem:[#allocation10 + $0x48] sm:$0xff]  ;;  %v347_v8 = vld [vmem:[#allocation10 + $0x40] sm:$0xff]  ;;  %v346_v9 = vld [vmem:[#allocation10 + $0x38] sm:$0xff] }
  0x56   : > { %883 = vmatprep.subr.mxu0 %v1170_v1  ;;  %918 = vmatprep.subr.mxu1 %v1170_v1  ;;  %v345_v10 = vld [vmem:[#allocation10 + $0x30] sm:$0xff]  ;;  %v344_v11 = vld [vmem:[#allocation10 + $0x28] sm:$0xff]  ;;  %v343_v12 = vld [vmem:[#allocation10 + $0x20] sm:$0xff] }
  0x57   : > { %884 = vmatpush3.msra.mxu0 %v353_v2  ;;  %919 = vmatpush3.msra.mxu1 %v353_v2  ;;  %v342_v13 = vld [vmem:[#allocation10 + $0x18] sm:$0xff]  ;;  %v341_v14 = vld [vmem:[#allocation10 + $0x10] sm:$0xff]  ;;  %v340_v15 = vld [vmem:[#allocation10 + $0x8] sm:$0xff] }
  0x58   : > { %885 = vmatprep.subr.mxu0 %v1170_v1  ;;  %920 = vmatprep.subr.mxu1 %v1170_v1  ;;  %v339_v16 = vld [vmem:[#allocation10] sm:$0xff]  ;;  %v338_v17 = vld [vmem:[#allocation6] sm:$0xff]  ;;  %v432_v18 = vld [vmem:[#allocation8] sm:$0xff] }
  0x59   : > { %886 = vmatpush3.msra.mxu0 %v352_v3  ;;  %921 = vmatpush3.msra.mxu1 %v352_v3  ;;  %v824_v19 = vld [vmem:[#allocation11] ss:$0 sm:$0xff] }
  0x5a   : > { %887 = vmatprep.subr.mxu0 %v1170_v1  ;;  %922 = vmatprep.subr.mxu1 %v1170_v1 }
  0x5b   : > { %888 = vmatpush3.msra.mxu0 %v351_v4  ;;  %923 = vmatpush3.msra.mxu1 %v351_v4 }
  0x5c   : > { %889 = vmatprep.subr.mxu0 %v1170_v1  ;;  %924 = vmatprep.subr.mxu1 %v1170_v1 }
  0x5d   : > { %890 = vmatpush3.msra.mxu0 %v350_v5  ;;  %925 = vmatpush3.msra.mxu1 %v350_v5 }
  0x5e   : > { %891 = vmatprep.subr.mxu0 %v1170_v1  ;;  %926 = vmatprep.subr.mxu1 %v1170_v1 }
  0x5f   : > { %892 = vmatpush3.msra.mxu0 %v349_v6  ;;  %927 = vmatpush3.msra.mxu1 %v349_v6 }
  0x60   : > { %893 = vmatprep.subr.mxu0 %v1170_v1  ;;  %928 = vmatprep.subr.mxu1 %v1170_v1 }
  0x61   : > { %894 = vmatpush3.msra.mxu0 %v348_v7  ;;  %929 = vmatpush3.msra.mxu1 %v348_v7 }
  0x62   : > { %895 = vmatprep.subr.mxu0 %v1170_v1  ;;  %930 = vmatprep.subr.mxu1 %v1170_v1 }
  0x63   : > { %896 = vmatpush3.msra.mxu0 %v347_v8  ;;  %931 = vmatpush3.msra.mxu1 %v347_v8 }
  0x64   : > { %897 = vmatprep.subr.mxu0 %v1170_v1  ;;  %932 = vmatprep.subr.mxu1 %v1170_v1 }
  0x65   : > { %898 = vmatpush3.msra.mxu0 %v346_v9  ;;  %933 = vmatpush3.msra.mxu1 %v346_v9 }
  0x66   : > { %899 = vmatprep.subr.mxu0 %v1170_v1  ;;  %934 = vmatprep.subr.mxu1 %v1170_v1 }
  0x67   : > { %900 = vmatpush3.msra.mxu0 %v345_v10  ;;  %935 = vmatpush3.msra.mxu1 %v345_v10 }
  0x68   : > { %901 = vmatprep.subr.mxu0 %v1170_v1  ;;  %936 = vmatprep.subr.mxu1 %v1170_v1 }
  0x69   : > { %902 = vmatpush3.msra.mxu0 %v344_v11  ;;  %937 = vmatpush3.msra.mxu1 %v344_v11 }
  0x6a   : > { %903 = vmatprep.subr.mxu0 %v1170_v1  ;;  %938 = vmatprep.subr.mxu1 %v1170_v1 }
  0x6b   : > { %904 = vmatpush3.msra.mxu0 %v343_v12  ;;  %939 = vmatpush3.msra.mxu1 %v343_v12 }
  0x6c   : > { %905 = vmatprep.subr.mxu0 %v1170_v1  ;;  %940 = vmatprep.subr.mxu1 %v1170_v1 }
  0x6d   : > { %906 = vmatpush3.msra.mxu0 %v342_v13  ;;  %941 = vmatpush3.msra.mxu1 %v342_v13 }
  0x6e   : > { %907 = vmatprep.subr.mxu0 %v1170_v1  ;;  %942 = vmatprep.subr.mxu1 %v1170_v1 }
  0x6f   : > { %908 = vmatpush3.msra.mxu0 %v341_v14  ;;  %943 = vmatpush3.msra.mxu1 %v341_v14 }
  0x70   : > { %909 = vmatprep.subr.mxu0 %v1170_v1  ;;  %944 = vmatprep.subr.mxu1 %v1170_v1 }
  0x71   : > { %910 = vmatpush3.msra.mxu0 %v340_v15  ;;  %913 = vmatprep.mubr.msk.f32.mxu0 %vm1171_vm0, %v1170_v1 }
  0x72   : > { %911 = vmatprep.subr.mxu0 %v1170_v1  ;;  %945 = vmatpush3.msra.mxu1 %v340_v15 }
  0x73   : > { %912 = vmatpush3.msra.mxu0 %v339_v16  ;;  %946 = vmatprep.subr.mxu1 %v1170_v1 }
  0x74   : > { %914 = vmatmul.mubr.f32.vlgmr.msra.gmra.mxu0 %v338_v17  ;;  %947 = vmatpush3.msra.mxu1 %v339_v16 }
  0x75   : > { %948 = vmatprep.mubr.msk.f32.mxu1 %vm1171_vm0, %v1170_v1 }
  0x76   : > { %949 = vmatmul.mubr.f32.vlgmr.msra.gmra.mxu1 %v432_v18 }
 0x134   : > { %v428_v20 = vpop.f32.mrf.mxu0 }
 0x135   : > { %v429_v21 = vadd.f32 %v824_v19, %v428_v20 }
 0x136   : > { %v915_v22 = vpop.f32.mrf.mxu0  ;;  %v499_v23 = vpop.f32.mrf.mxu1 }
 0x137   : > { %v500_v24 = vadd.f32 %v824_v19, %v499_v23  ;;  %v503_v25 = vmul.f32 %v429_v21, %v429_v21 }
 0x138   : > { %v950_v26 = vpop.f32.mrf.mxu1 }
 0x139   : > { %504 = vadd.xlane.f32.xlu0 %v503_v25  ;;  %v509_v27 = vmul.f32 %v500_v24, %v500_v24 }
 0x13d   : > { %510 = vadd.xlane.f32.xlu0 %v509_v27 }
 0x1c2   : > { %v505_v28 = vpop.xlane.xlu0 %504 }
 0x1c3   : > { %v506_v29 = vmax.f32 %v505_v28, 1e-24 }
 0x1c5   : > { %1026 = vrsqrt.f32 %v506_v29 }
 0x1c6   : > { %v511_v30 = vpop.xlane.xlu0 %510 }
 0x1c7   : > { %v512_v31 = vmax.f32 %v511_v30, 1e-24 }
 0x1c9   : > { %1028 = vrsqrt.f32 %v512_v31 }
 0x1d2   : > { %v1027_v32 = vpop.eup %1026 }
 0x1d3   : > { %v508_v33 = vmul.f32 %v1027_v32, %v429_v21 }
 0x1d5   : > { %v515_v34 = vmul.f32 14.285714, %v508_v33 }
 0x1d6   : > { %v1029_v35 = vpop.eup %1028 }
 0x1d7   : > { %v514_v36 = vmul.f32 %v1029_v35, %v500_v24  ;;  %v520_v37 = vpack.c.bf16 %v515_v34, %v515_v34 }
 0x1d9   : > { %v516_v38 = vmul.f32 %v515_v34, %v514_v36  ;;  %521 = vst [vmem:[#allocation2] sm:$0xf] %v520_v37  ;;  %v522_v39 = vpack.c.bf16 %v514_v36, %v514_v36 }
 0x1db   : > { %523 = vst [vmem:[#allocation3] sm:$0xf] %v522_v39  ;;  %517 = vadd.xlane.f32.xlu1 %v516_v38 }
 0x264   : > { %v518_v40 = vpop.xlane.xlu1 %517 }
 0x265   : > { %519 = vst [vmem:[%s1384_s7] sm:$0xff] %v518_v40 }
 0x266 PF: > { %v1030_v41 = vld [vmem:[%s1320_s24 + $0x38] sm:$0xff]   ;;  %v1172_v42 = vmov 0.0   ;;  %vm1173_vm1 = vmmov 0   ;;  %v1031_v43 = vld [vmem:[%s1320_s24 + $0x30] sm:$0xff]   ;;  %v1032_v44 = vld [vmem:[%s1320_s24 + $0x28] sm:$0xff]   ;;  %p833_p8 = scmp.ne.s32.totalorder %s1233_s13, 3 }
 0x267   : > { %951 = vmatprep.subr.bf16.mxu0 %v1172_v42  ;;  %967 = vmatprep.mubr.msk.bf16.mxu0 %vm1173_vm1, %v1172_v42  ;;  %v1033_v45 = vld [vmem:[%s1320_s24 + $0x20] sm:$0xff]   ;;  %v1034_v46 = vld [vmem:[%s1320_s24 + $0x18] sm:$0xff]   ;;  %v1035_v47 = vld [vmem:[%s1320_s24 + $0x10] sm:$0xff]   ;;  %s634_s27 = sld [smem:[#allocation5]] (!%p833_p8) }
 0x268   : > { %952 = vmatpush3.bf16.xpose.msra.mxu0 %v1030_v41  ;;  %v1036_v48 = vld [vmem:[%s1320_s24 + $0x8] sm:$0xff]   ;;  %v1037_v49 = vld [vmem:[%s1320_s24] sm:$0xff]  }
 0x269   : > { %953 = vmatprep.subr.bf16.mxu0 %v1172_v42  ;;  %v524_v50 = vld [vmem:[#allocation2] sm:$0xf] }
 0x26d   : > { %s635_s28 = sshra.s32 (!%p833_p8), %s634_s27, 3 }
 0x26e   : > { %s834_s29 = sshll.u32 (!%p833_p8), %s635_s28, 2 }
 0x26f   : > { %s638_s6 = scalar_lea.vmem (!%p833_p8), %s1386_s9, %s834_s29 }
 0x270   : > { %954 = vmatpush3.bf16.xpose.msra.mxu0 %v1031_v43 }
 0x271   : > { %955 = vmatprep.subr.bf16.mxu0 %v1172_v42 }
 0x278   : > { %956 = vmatpush3.bf16.xpose.msra.mxu0 %v1032_v44 }
 0x279   : > { %957 = vmatprep.subr.bf16.mxu0 %v1172_v42 }
 0x280   : > { %958 = vmatpush3.bf16.xpose.msra.mxu0 %v1033_v45 }
 0x281   : > { %959 = vmatprep.subr.bf16.mxu0 %v1172_v42 }
 0x288   : > { %960 = vmatpush3.bf16.xpose.msra.mxu0 %v1034_v46 }
 0x289   : > { %961 = vmatprep.subr.bf16.mxu0 %v1172_v42 }
 0x290   : > { %962 = vmatpush3.bf16.xpose.msra.mxu0 %v1035_v47 }
 0x291   : > { %963 = vmatprep.subr.bf16.mxu0 %v1172_v42 }
 0x298   : > { %964 = vmatpush3.bf16.xpose.msra.mxu0 %v1036_v48 }
 0x299   : > { %965 = vmatprep.subr.bf16.mxu0 %v1172_v42 }
 0x2a0   : > { %966 = vmatpush3.bf16.xpose.msra.mxu0 %v1037_v49 }
 0x2a7   : > { %968 = vmatmul.mubr.bf16.vlgmr.msra.gmra.mxu0 %v524_v50 }
 0x367   : > { %v623_v51 = vpop.f32.mrf.mxu0 }
 0x368   : > { %629 = vst [vmem:[%s1315_s21] sm:$0xff] %v623_v51 }
 0x369   : > { %v969_v52 = vpop.f32.mrf.mxu0  ;;  %633 = sbr.rel (%p833_p8) target bundleno = 883 (0x373), region = 68 }
 0x36b   : > { %v626_v53 = vpop.f32.mrf.mxu0 }
 0x36d   : > { %v970_v54 = vpop.f32.mrf.mxu0 }
 0x36e   : > { %v657_v55 = vld [vmem:[#allocation3] sm:$0xf] }
 0x36f   : > { %658 = vst [vmem:[%s638_s6] sm:$0xf] %v657_v55 }
 0x370   : > { %684 = vsyncadd [#allocation4], 64 }
 0x371   : > { %1158 = dma.done.wait [#allocation4], 64 }
 0x372   : > { %1159 = vsyncadd [#allocation4], 4294967232 }
 0x373 PF: > { %s24_s11 = sadd.s32 1, %s1162_s11  }
 0x374   : > { %p21_p9 = scmp.ge.s32.totalorder %s24_s11, 6  }
 0x376   :  { %23 = sbr.rel (!%p21_p9) target bundleno = 5 (0x5), region = 148 }
 0x37b   :  { %714 = vsyncpa [#allocation7], 1 }
 0x37c   :  { %716 = vsyncpa [#allocation7 + $0x1], 1 }
 0x37d   :  { %717 = vsyncpa [#allocation9], 1 }
 0x37e   :  { %718 = vsyncpa [#allocation12], 1 }
 0x37f   :  { %719 = vsyncmov [#allocation4] }
 0x382   :  { %s720_s13 = vpop.sfrf %719 }
 0x383   :  { %p837_p10 = scmp.ne.s32.totalorder %s720_s13, 0 }
 0x385   :  { %724 = shalt.err (%p837_p10)  }

</bundles_post_ra>
